<compile_context>
chip_gen: v6e
topology: v6e:2x2x1
jax: 0.10.0
libtpu: 0.0.40
codegen_flags: <defaults>
</compile_context>

<pallas_src>
import jax
import jax.numpy as jnp
from jax.experimental import pallas as pl
from jax.experimental.pallas import tpu as pltpu


def _make_fusion_kernel(num_modalities):
    """Kernel over (tile_n, D) row tiles; unrolled MAC over the static M axis."""
    def kernel(*refs):
        sm_ref = refs[0]                              # (M, D) f32 softmaxed weights
        x_refs = refs[1:1 + num_modalities]           # M x (TN, D) input tiles
        o_ref = refs[1 + num_modalities]              # (TN, D) output tile
        # f32 multiply + f32 accumulate; single (TN, D) accumulator live.
        acc = x_refs[0][...].astype(jnp.float32) * sm_ref[0:1, :]
        for m in range(1, num_modalities):
            acc = acc + x_refs[m][...].astype(jnp.float32) * sm_ref[m:m + 1, :]
        o_ref[...] = acc.astype(o_ref.dtype)
    return kernel


def _vmem_capacity_bytes():
    try:
        return int(pltpu.get_tpu_info().vmem_capacity_bytes)
    except Exception:
        return 64 * 1024 * 1024  # conservative fallback (v7x physical VMEM)


def dynamic_weighted_fusion(weights, inputs):
    """weights: (M, D) f32 param; inputs: list/tuple of M arrays (..., D).

    Returns the fused array with the same leading shape and dtype as inputs[0].
    """
    M, D = weights.shape
    assert len(inputs) == M, "number of inputs must match num_modalities"
    lead_shape = inputs[0].shape[:-1]
    for i, inp in enumerate(inputs):
        if inp.shape[-1] != D:
            raise ValueError(
                f"Input tensor at index {i} has shape {inp.shape[-1]}, but expected {D}.")
        assert inp.shape[:-1] == lead_shape, "all inputs must share leading dims"

    x_dtype = inputs[0].dtype
    N = 1
    for s in lead_shape:
        N *= int(s)

    # Softmax hoisted out of the kernel; stays f32 (weights sum to 1 exactly).
    sm = jax.nn.softmax(weights.astype(jnp.float32), axis=0)

    # Flatten each modality to (N, D) -- a view, no HBM copy.
    xs = [inp.reshape(N, D) for inp in inputs]

    # --- lane-folding: fold k rows into the lane axis when D < 128 -------------
    Nf, Df = N, D
    if D < 128 and (128 % D == 0):
        k = 128 // D
        if N % k == 0:
            Nf, Df = N // k, k * D
            xs = [x.reshape(Nf, Df) for x in xs]
            sm = jnp.tile(sm, (1, k))
    # TODO(synk): D > 128 and not a multiple of 128 is left unfolded (legal but
    #             uses masked partial stores on the ragged lane tail).

    # --- tile sizing: HBM-bandwidth-bound -> tiles as big as useful ------------
    itemsize = jnp.dtype(x_dtype).itemsize
    sublane = max(8, 32 // itemsize)                 # 8 f32 / 16 bf16 / 32 int8

    cap = _vmem_capacity_bytes()
    vmem_limit_bytes = (3 * cap) // 4                # 48 MiB on v7x, 96 MiB on v5e/v6e
    budget = max(8 * 1024 * 1024,
                 vmem_limit_bytes - 8 * 1024 * 1024)  # headroom for Mosaic scratch

    fixed_bytes = 2 * M * Df * 4                     # resident f32 weight block
    per_row_bytes = (2 * (M + 1) * Df * itemsize     # double-buffered M inputs + output
                     + Df * 4)                       # f32 accumulator (not pipelined)
    max_rows_vmem = max(sublane, (budget - fixed_bytes) // per_row_bytes)
    slab_rows = max(sublane, (2 * 1024 * 1024) // (Df * itemsize))  # ~2 MiB slab
    tile_n = min(max_rows_vmem, slab_rows)
    tile_n = max(sublane, (int(tile_n) // sublane) * sublane)
    n_ceil = -(-Nf // sublane) * sublane
    tile_n = min(tile_n, n_ceil)                     # don't exceed (rounded-up) N

    grid = (pl.cdiv(Nf, tile_n),)

    sm_spec = pl.BlockSpec((M, Df), lambda i: (0, 0))
    x_specs = [pl.BlockSpec((tile_n, Df), lambda i: (i, 0)) for _ in range(M)]
    out_spec = pl.BlockSpec((tile_n, Df), lambda i: (i, 0))

    out_flat = pl.pallas_call(
        _make_fusion_kernel(M),
        out_shape=jax.ShapeDtypeStruct((Nf, Df), x_dtype),
        grid_spec=pltpu.PrefetchScalarGridSpec(
            num_scalar_prefetch=0,
            grid=grid,
            in_specs=[sm_spec] + x_specs,
            out_specs=out_spec,
        ),
        compiler_params=pltpu.CompilerParams(
            dimension_semantics=("parallel",),
            vmem_limit_bytes=int(vmem_limit_bytes),
        ),
    )(sm, *xs)

    return out_flat.reshape(lead_shape + (D,))


def _run_case(key, num_modalities, batch, seq, input_dim, dtype, atol, rtol):
    weights = jnp.ones((num_modalities, input_dim), dtype=jnp.float32)
    keys = jax.random.split(key, num_modalities)
    inputs = [jax.random.normal(k, (batch, seq, input_dim), dtype=dtype) for k in keys]

    out = jax.block_until_ready(dynamic_weighted_fusion(weights, inputs))

    # Pure-JAX reference (f32 weights, f32 math), matching PyTorch forward.
    sm = jax.nn.softmax(weights.astype(jnp.float32), axis=0)
    ref = sum(sm[m] * inputs[m].astype(jnp.float32) for m in range(num_modalities))

    assert out.shape == inputs[0].shape, "output shape mismatch"
    assert out.dtype == inputs[0].dtype, "output dtype mismatch"
    assert jnp.allclose(out.astype(jnp.float32), ref, atol=atol, rtol=rtol), \
        "mismatch vs reference"


if __name__ == "__main__":
    key = jax.random.PRNGKey(0)
    k1, k2, k3, k4 = jax.random.split(key, 4)

    # Small case matching the module's typical use (batch=2, seq=8, input_dim=128).
    _run_case(k1, num_modalities=3, batch=2, seq=8, input_dim=128,
              dtype=jnp.float32, atol=1e-5, rtol=1e-5)

    # Multi-step grid + N not a multiple of 8 (exercises the masked edge block).
    _run_case(k2, num_modalities=3, batch=3, seq=347, input_dim=128,
              dtype=jnp.float32, atol=1e-5, rtol=1e-5)

    # bf16 inputs: f32 weights / f32 accumulate in-kernel, bf16 store.
    _run_case(k3, num_modalities=3, batch=2, seq=64, input_dim=128,
              dtype=jnp.bfloat16, atol=2e-2, rtol=2e-2)

    # D < 128: lane-folding path (D=64 folded into 128-wide lanes).
    _run_case(k4, num_modalities=2, batch=2, seq=8, input_dim=64,
              dtype=jnp.float32, atol=1e-5, rtol=1e-5)

    print("KERNEL_OK")
</pallas_src>

<mosaic_0001>
module attributes {stable_mosaic.version = 11 : i64} {
  func.func @kernel(%arg0: i32, %arg1: memref<3x128xf32, #tpu.memory_space<vmem>>, %arg2: memref<16x128xf32, #tpu.memory_space<vmem>>, %arg3: memref<16x128xf32, #tpu.memory_space<vmem>>, %arg4: memref<16x128xf32, #tpu.memory_space<vmem>>, %arg5: memref<16x128xf32, #tpu.memory_space<vmem>>) attributes {dimension_semantics = [#tpu.dimension_semantics<parallel>], iteration_bounds = array<i64: 1>, scalar_prefetch = 0 : i64, scratch_operands = 0 : i64, tpu.core_type = #tpu.core_type<tc>, window_params = [{pipeline_mode = #tpu.pipeline_mode<synchronous>, transform_indices = @transform_0, window_bounds = array<i64: 3, 128>}, {transform_indices = @transform_1, window_bounds = array<i64: 16, 128>}, {transform_indices = @transform_2, window_bounds = array<i64: 16, 128>}, {transform_indices = @transform_3, window_bounds = array<i64: 16, 128>}, {transform_indices = @transform_4, window_bounds = array<i64: 16, 128>}]} {
    %c0 = arith.constant 0 : index
    %c0_0 = arith.constant 0 : index
    %0 = vector.load %arg2[%c0, %c0_0] : memref<16x128xf32, #tpu.memory_space<vmem>>, vector<16x128xf32>
    %c0_1 = arith.constant 0 : index
    %c0_2 = arith.constant 0 : index
    %1 = vector.load %arg1[%c0_1, %c0_2] : memref<3x128xf32, #tpu.memory_space<vmem>>, vector<1x128xf32>
    %2 = vector.broadcast %1 : vector<1x128xf32> to vector<16x128xf32>
    %3 = arith.mulf %0, %2 : vector<16x128xf32>
    %c0_3 = arith.constant 0 : index
    %c0_4 = arith.constant 0 : index
    %4 = vector.load %arg3[%c0_3, %c0_4] : memref<16x128xf32, #tpu.memory_space<vmem>>, vector<16x128xf32>
    %c1 = arith.constant 1 : index
    %c0_5 = arith.constant 0 : index
    %5 = vector.load %arg1[%c1, %c0_5] : memref<3x128xf32, #tpu.memory_space<vmem>>, vector<1x128xf32>
    %6 = vector.broadcast %5 : vector<1x128xf32> to vector<16x128xf32>
    %7 = arith.mulf %4, %6 : vector<16x128xf32>
    %8 = arith.addf %3, %7 : vector<16x128xf32>
    %c0_6 = arith.constant 0 : index
    %c0_7 = arith.constant 0 : index
    %9 = vector.load %arg4[%c0_6, %c0_7] : memref<16x128xf32, #tpu.memory_space<vmem>>, vector<16x128xf32>
    %c2 = arith.constant 2 : index
    %c0_8 = arith.constant 0 : index
    %10 = vector.load %arg1[%c2, %c0_8] : memref<3x128xf32, #tpu.memory_space<vmem>>, vector<1x128xf32>
    %11 = vector.broadcast %10 : vector<1x128xf32> to vector<16x128xf32>
    %12 = arith.mulf %9, %11 : vector<16x128xf32>
    %13 = arith.addf %8, %12 : vector<16x128xf32>
    %c0_9 = arith.constant 0 : index
    %c0_10 = arith.constant 0 : index
    %14 = vector.load %arg5[%c0_9, %c0_10] : memref<16x128xf32, #tpu.memory_space<vmem>>, vector<16x128xf32>
    tpu.vector_store %arg5[%c0_9, %c0_10], %13 {strides = array<i32>} : memref<16x128xf32, #tpu.memory_space<vmem>>, vector<16x128xf32>,
    return
  }
  func.func @transform_0(%arg0: i32) -> (i32, i32) {
    %c0_i32 = arith.constant 0 : i32
    %c0_i32_0 = arith.constant 0 : i32
    %c0_i32_1 = arith.constant 0 : i32
    return %c0_i32, %c0_i32_0 : i32, i32
  }
  func.func @transform_1(%arg0: i32) -> (i32, i32) {
    %c0_i32 = arith.constant 0 : i32
    %c0_i32_0 = arith.constant 0 : i32
    return %arg0, %c0_i32 : i32, i32
  }
  func.func @transform_2(%arg0: i32) -> (i32, i32) {
    %c0_i32 = arith.constant 0 : i32
    %c0_i32_0 = arith.constant 0 : i32
    return %arg0, %c0_i32 : i32, i32
  }
  func.func @transform_3(%arg0: i32) -> (i32, i32) {
    %c0_i32 = arith.constant 0 : i32
    %c0_i32_0 = arith.constant 0 : i32
    return %arg0, %c0_i32 : i32, i32
  }
  func.func @transform_4(%arg0: i32) -> (i32, i32) {
    %c0_i32 = arith.constant 0 : i32
    %c0_i32_0 = arith.constant 0 : i32
    return %arg0, %c0_i32 : i32, i32
  }
}

</mosaic_0001>

<bundles_post_ra>
// kernel: tpu_custom_call.1
= control target key start
LH: loop header
LB: loop body
LE: loop exit
PB: predicated region body
PF: predicated region fallthrough
CT: control target
= control target key end

     0   :  { %9 = vsyncpa [#allocation3], 0  ;;  %s300_s0 = inlined_call_operand.hbm [shape: f32[3,128], index: 0, kind: input, shape index: {}]   ;;  %s301_s1 = inlined_call_operand.hbm [shape: f32[16,128], index: 1, kind: input, shape index: {}]   ;;  %s302_s2 = inlined_call_operand.hbm [shape: f32[16,128], index: 2, kind: input, shape index: {}]   ;;  %s303_s3 = inlined_call_operand.hbm [shape: f32[16,128], index: 3, kind: input, shape index: {}]   ;;  %s304_s4 = inlined_call_operand.hbm [shape: f32[16,128], index: 4, kind: output, shape index: {}]  }
   0x1   :  { %10 = vsyncpa [#allocation6], 0 }
   0x2   :  { %11 = vsyncpa [#allocation9], 0 }
   0x3   :  { %12 = vsyncpa [#allocation4], 0  ;;  %s241_s15 = smov [#allocation5]  }
   0x4   :  { %s28_s16 = sshll.u32 %s241_s15, 4  ;;  %s29_s16 = int_to_ptr.vmem [resolvable:$true] %s28_s16 }
   0x5   :  { %s141_s17 = scalar_lea.vmem %s29_s16, 256  ;;  %p146_p1 = scmp.lt.s32.totalorder %s29_s16, %s29_s16 }
   0x6   :  { %p142_p0 = scmp.ne.s32.totalorder %s29_s16, %s141_s17  ;;  %p147_p2 = scmp.lt.s32.totalorder %s141_s17, %s141_s17 }
   0x8   :  { %p148_p3 = por %p147_p2, %p146_p1 }
   0xa   :  { %p149_p4 = pnand %p148_p3, %p142_p0 }
   0xc   :  { %152 = shalt.err (!%p149_p4)
}
   0xd   :  { %s242_s18 = smov 128   ;;  %s243_s19 = smov 8  }
   0xe   :  { %34 = dma.hbm_to_vmem [thread:$0]  %s301_s1, 256, %s29_s16, [#allocation6], %s242_s18, %s242_s18, %s243_s19  }
   0xf   :  { %s244_s22 = smov [#allocation2]   ;;  %s245_s24 = smov [#allocation7]  }
  0x10   :  { %s19_s23 = sshll.u32 %s244_s22, 4  ;;  %s40_s25 = sshll.u32 %s245_s24, 4  ;;  %s20_s23 = int_to_ptr.vmem [resolvable:$true] %s19_s23  ;;  %s41_s25 = int_to_ptr.vmem [resolvable:$true] %s40_s25 }
  0x11   :  { %s161_s26 = scalar_lea.vmem %s20_s23, 64  ;;  %p166_p6 = scmp.lt.s32.totalorder %s20_s23, %s20_s23 }
  0x12   :  { %p162_p5 = scmp.ne.s32.totalorder %s20_s23, %s161_s26  ;;  %p167_p7 = scmp.lt.s32.totalorder %s161_s26, %s161_s26 }
  0x14   :  { %p168_p8 = por %p167_p7, %p166_p6 }
  0x16   :  { %p169_p9 = pnand %p168_p8, %p162_p5 }
  0x18   :  { %172 = shalt.err (!%p169_p9)
}
  0x19   :  { %22 = dma.hbm_to_vmem [thread:$0]  %s300_s0, 64, %s20_s23, [#allocation3]  }
  0x1a   :  { %s181_s29 = scalar_lea.vmem %s41_s25, 256  ;;  %p186_p11 = scmp.lt.s32.totalorder %s41_s25, %s41_s25 }
  0x1b   :  { %p182_p10 = scmp.ne.s32.totalorder %s41_s25, %s181_s29  ;;  %p187_p12 = scmp.lt.s32.totalorder %s181_s29, %s181_s29 }
  0x1d   :  { %p188_p13 = por %p187_p12, %p186_p11 }
  0x1f   :  { %p189_p0 = pnand %p188_p13, %p182_p10 }
  0x21   :  { %192 = shalt.err (!%p189_p0)
}
  0x22   :  { %46 = dma.hbm_to_vmem [thread:$0]  %s302_s2, 256, %s41_s25, [#allocation6], %s242_s18, %s242_s18, %s243_s19  }
  0x23   :  { %s246_s5 = smov [#allocation8]  }
  0x24   :  { %s52_s6 = sshll.u32 %s246_s5, 4  ;;  %s53_s6 = int_to_ptr.vmem [resolvable:$true] %s52_s6 }
  0x25   :  { %s201_s7 = scalar_lea.vmem %s53_s6, 256  ;;  %p206_p2 = scmp.lt.s32.totalorder %s53_s6, %s53_s6 }
  0x26   :  { %p202_p1 = scmp.ne.s32.totalorder %s53_s6, %s201_s7  ;;  %p207_p3 = scmp.lt.s32.totalorder %s201_s7, %s201_s7 }
  0x28   :  { %p208_p4 = por %p207_p3, %p206_p2 }
  0x2a   :  { %p209_p5 = pnand %p208_p4, %p202_p1 }
  0x2c   :  { %212 = shalt.err (!%p209_p5)
}
  0x2d   :  { %58 = dma.hbm_to_vmem [thread:$0]  %s303_s3, 256, %s53_s6, [#allocation9], %s242_s18, %s242_s18, %s243_s19  }
  0x2e   :  { %233 = dma.done.wait [#allocation3], 64  }
  0x2f   :  { %234 = vsyncadd [#allocation3], 4294967232 }
  0x30   :  { %235 = dma.done.wait [#allocation6], 512  }
  0x31   :  { %236 = vsyncadd [#allocation6], 4294966784 }
  0x32   :  { %237 = dma.done.wait [#allocation9], 256  }
  0x33   :  { %238 = vsyncadd [#allocation9], 4294967040  ;;  %v71_v0 = vld [vmem:[#allocation5] sm:$0xff]  ;;  %v123_v1 = vld [vmem:[#allocation2] ss:$0 sm:$0xff]  ;;  %s247_s2 = smov [#allocation10]  }
  0x34   :  { %v80_v2 = vld [vmem:[#allocation7] sm:$0xff]  ;;  %v78_v3 = vmul.f32 %v123_v1, %v71_v0  ;;  %v124_v4 = vld [vmem:[#allocation2 + $0x1] ss:$0 sm:$0xff]  ;;  %v91_v5 = vld [vmem:[#allocation8] sm:$0xff]  ;;  %s109_s3 = sshll.u32 %s247_s2, 4  ;;  %s110_s3 = int_to_ptr.vmem [resolvable:$true] %s109_s3 }
  0x35   :  { %v125_v6 = vld [vmem:[#allocation2 + $0x2] ss:$0 sm:$0xff]  ;;  %v87_v7 = vmul.f32 %v124_v4, %v80_v2  ;;  %v72_v9 = vld [vmem:[#allocation5 + $0x8] sm:$0xff]  ;;  %s213_s9 = scalar_lea.vmem %s110_s3, 256  ;;  %p218_p7 = scmp.lt.s32.totalorder %s110_s3, %s110_s3 }
  0x36   :  { %v98_v8 = vmul.f32 %v125_v6, %v91_v5  ;;  %v81_v10 = vld [vmem:[#allocation7 + $0x8] sm:$0xff]  ;;  %v92_v11 = vld [vmem:[#allocation8 + $0x8] sm:$0xff]  ;;  %v79_v12 = vmul.f32 %v123_v1, %v72_v9  ;;  %p214_p6 = scmp.ne.s32.totalorder %s110_s3, %s213_s9  ;;  %p219_p8 = scmp.lt.s32.totalorder %s213_s9, %s213_s9 }
  0x37   :  { %v88_v13 = vmul.f32 %v124_v4, %v81_v10  ;;  %v99_v14 = vmul.f32 %v125_v6, %v92_v11  ;;  %v89_v15 = vadd.f32 %v87_v7, %v78_v3 }
  0x38   :  { %p220_p9 = por %p219_p8, %p218_p7 }
  0x39   :  { %v90_v16 = vadd.f32 %v88_v13, %v79_v12  ;;  %v100_v17 = vadd.f32 %v98_v8, %v89_v15 }
  0x3a   :  { %p221_p10 = pnand %p220_p9, %p214_p6 }
  0x3b   :  { %v101_v18 = vadd.f32 %v99_v14, %v90_v16  ;;  %102 = vst [vmem:[#allocation10] sm:$0xff] %v100_v17 }
  0x3d   :  { %103 = vst [vmem:[#allocation10 + $0x8] sm:$0xff] %v101_v18 }
  0x3e   :  { %224 = shalt.err (!%p221_p10)
}
  0x3f   :  { %115 = dma.vmem_to_hbm [thread:$0]  %s110_s3, 256, %s304_s4, [#allocation4], %s242_s18, %s242_s18, %s243_s19  }
  0x40   :  { %239 = dma.done.wait [#allocation4], 256  }
  0x41   :  { %240 = vsyncadd [#allocation4], 4294967040 }
  0x42   :  { %119 = vsyncpa [#allocation3], 1 }
  0x43   :  { %120 = vsyncpa [#allocation6], 1 }
  0x44   :  { %121 = vsyncpa [#allocation9], 1 }
  0x45   :  { %122 = vsyncpa [#allocation4], 1 }

</bundles_post_ra>
